<compile_context>
chip_gen: v5e
topology: v5e:2x2
jax: 0.10.0
libtpu: 0.0.40
codegen_flags: <defaults>
</compile_context>

<pallas_src>
import functools

import jax
import jax.numpy as jnp
from jax.experimental import pallas as pl
from jax.experimental.pallas import tpu as pltpu


def _round_up(x, m):
    return ((x + m - 1) // m) * m


def _cwd_kernel(s_ref, t_ref, out_ref, *, inv_tau, scale):
    # s_ref/t_ref: (TILE_NC, HW) VMEM tiles; out_ref: (1,) f32 in SMEM.
    i = pl.program_id(0)

    @pl.when(i == 0)
    def _():
        out_ref[0] = jnp.float32(0.0)

    # Single read of each tile; everything else is derived in registers.
    s = s_ref[...].astype(jnp.float32) * inv_tau
    t = t_ref[...].astype(jnp.float32) * inv_tau

    # Numerically stable per-row softmax / log-softmax pieces.
    t_max = jnp.max(t, axis=1, keepdims=True)
    s_max = jnp.max(s, axis=1, keepdims=True)
    t_sh = t - t_max
    s_sh = s - s_max
    et = jnp.exp(t_sh)                       # EUP
    es = jnp.exp(s_sh)                       # EUP
    zt = jnp.sum(et, axis=1, keepdims=True)  # XLU row reduce
    zs = jnp.sum(es, axis=1, keepdims=True)

    # Per-row KL(p_T || p_S) with the log-partition terms factored out:
    #   sum_j p_T * ((t_sh - s_sh) - (log zt - log zs))
    # and sum_j p_T == 1, so the (log zt - log zs) part is a single per-row scalar.
    p_t = et * pl.reciprocal(zt, approx=False)
    cross = jnp.sum(p_t * (t_sh - s_sh), axis=1, keepdims=True)
    row_kl = cross - (jnp.log(zt) - jnp.log(zs))

    # One cross-lane reduction per tile, accumulated into the SMEM scalar.
    out_ref[0] += jnp.sum(row_kl)

    @pl.when(i == pl.num_programs(0) - 1)
    def _():
        out_ref[0] = out_ref[0] * scale


def channel_wise_divergence(preds_S, preds_T, tau=4.0, loss_weight=1.0):
    """preds_S, preds_T: (N, C, H, W) arrays of identical shape. Returns f32 scalar."""
    assert preds_S.shape == preds_T.shape
    n, c, h, w = preds_S.shape
    nc, hw = n * c, h * w

    s2d = preds_S.reshape(nc, hw)
    t2d = preds_T.reshape(nc, hw)

    # Tile rows so one f32 input block is ~2 MiB; keep full HW (lane-dense) per block.
    bytes_per_row = hw * 4
    tile_nc = max(8, (2 * 1024 * 1024) // bytes_per_row)
    tile_nc = max(8, (tile_nc // 8) * 8)
    tile_nc = min(tile_nc, _round_up(nc, 8))

    padded_nc = _round_up(nc, tile_nc)
    if padded_nc != nc:
        pad = padded_nc - nc
        # All-zero padded rows contribute exactly 0 to the KL sum.
        s2d = jnp.pad(s2d, ((0, pad), (0, 0)))
        t2d = jnp.pad(t2d, ((0, pad), (0, 0)))

    grid = (padded_nc // tile_nc,)

    kernel = functools.partial(
        _cwd_kernel,
        inv_tau=1.0 / float(tau),
        scale=float(loss_weight) * float(tau) ** 2 / float(c * n),
    )

    out = pl.pallas_call(
        kernel,
        out_shape=jax.ShapeDtypeStruct((1,), jnp.float32),
        grid=grid,
        in_specs=[
            pl.BlockSpec((tile_nc, hw), lambda i: (i, 0)),
            pl.BlockSpec((tile_nc, hw), lambda i: (i, 0)),
        ],
        out_specs=pl.BlockSpec(memory_space=pltpu.SMEM),
        compiler_params=pltpu.CompilerParams(
            dimension_semantics=("arbitrary",),   # sequential scalar accumulation
            vmem_limit_bytes=48 * 1024 * 1024,    # headroom on v5e; within v7x 64 MiB
        ),
    )(s2d, t2d)
    return out[0]


if __name__ == "__main__":
    key = jax.random.PRNGKey(0)
    k1, k2 = jax.random.split(key)
    N, C, H, W = 2, 4, 16, 16
    tau, loss_weight = 4.0, 1.0
    preds_S = jax.random.normal(k1, (N, C, H, W), dtype=jnp.float32)
    preds_T = jax.random.normal(k2, (N, C, H, W), dtype=jnp.float32)

    loss = channel_wise_divergence(preds_S, preds_T, tau=tau, loss_weight=loss_weight)
    jax.block_until_ready(loss)

    # Pure-JAX reference (same math as the torch module).
    s = preds_S.reshape(-1, H * W) / tau
    t = preds_T.reshape(-1, H * W) / tau
    p_t = jax.nn.softmax(t, axis=1)
    ref = jnp.sum(p_t * (jax.nn.log_softmax(t, axis=1) - jax.nn.log_softmax(s, axis=1)))
    ref = loss_weight * ref * tau ** 2 / (C * N)

    assert jnp.allclose(loss, ref, rtol=1e-5, atol=1e-6), (loss, ref)
    print("KERNEL_OK")
</pallas_src>

<mosaic_0001>
module attributes {stable_mosaic.version = 11 : i64} {
  func.func @_cwd_kernel(%arg0: i32, %arg1: memref<8x256xf32, #tpu.memory_space<vmem>>, %arg2: memref<8x256xf32, #tpu.memory_space<vmem>>, %arg3: memref<1xf32, #tpu.memory_space<smem>>) attributes {dimension_semantics = [#tpu.dimension_semantics<arbitrary>], iteration_bounds = array<i64: 1>, scalar_prefetch = 0 : i64, scratch_operands = 0 : i64, tpu.core_type = #tpu.core_type<tc>, window_params = [{transform_indices = @transform_0, window_bounds = array<i64: 8, 256>}, {transform_indices = @transform_1, window_bounds = array<i64: 8, 256>}, {transform_indices = @transform_2, window_bounds = array<i64: 1>}]} {
    %c0_i32 = arith.constant 0 : i32
    %0 = arith.cmpi eq, %arg0, %c0_i32 : i32
    %1 = arith.extui %0 : i1 to i32
    %c0_i32_0 = arith.constant 0 : i32
    %2 = arith.cmpi ne, %1, %c0_i32_0 : i32
    scf.if %2 {
      %cst_15 = arith.constant 0.000000e+00 : f32
      %c0_16 = arith.constant 0 : index
      %44 = memref.load %arg3[%c0_16] : memref<1xf32, #tpu.memory_space<smem>>
      memref.store %cst_15, %arg3[%c0_16] : memref<1xf32, #tpu.memory_space<smem>>
    } else {
    }
    %c0 = arith.constant 0 : index
    %c0_1 = arith.constant 0 : index
    %3 = vector.load %arg1[%c0, %c0_1] : memref<8x256xf32, #tpu.memory_space<vmem>>, vector<8x256xf32>
    %cst = arith.constant 2.500000e-01 : f32
    %4 = vector.broadcast %cst : f32 to vector<8x256xf32>
    %5 = arith.mulf %3, %4 : vector<8x256xf32>
    %c0_2 = arith.constant 0 : index
    %c0_3 = arith.constant 0 : index
    %6 = vector.load %arg2[%c0_2, %c0_3] : memref<8x256xf32, #tpu.memory_space<vmem>>, vector<8x256xf32>
    %cst_4 = arith.constant 2.500000e-01 : f32
    %7 = vector.broadcast %cst_4 : f32 to vector<8x256xf32>
    %8 = arith.mulf %6, %7 : vector<8x256xf32>
    %cst_5 = arith.constant dense<0xFF800000> : vector<8xf32>
    %9 = vector.multi_reduction <maximumf>, %8, %cst_5 [1] : vector<8x256xf32> to vector<8xf32>
    %10 = vector.shape_cast %9 : vector<8xf32> to vector<8x1xf32>
    %cst_6 = arith.constant dense<0xFF800000> : vector<8xf32>
    %11 = vector.multi_reduction <maximumf>, %5, %cst_6 [1] : vector<8x256xf32> to vector<8xf32>
    %12 = vector.shape_cast %11 : vector<8xf32> to vector<8x1xf32>
    %13 = vector.broadcast %10 : vector<8x1xf32> to vector<8x256xf32>
    %14 = arith.subf %8, %13 : vector<8x256xf32>
    %15 = vector.broadcast %12 : vector<8x1xf32> to vector<8x256xf32>
    %16 = arith.subf %5, %15 : vector<8x256xf32>
    %17 = math.exp %14 : vector<8x256xf32>
    %18 = math.exp %16 : vector<8x256xf32>
    %cst_7 = arith.constant dense<0.000000e+00> : vector<8xf32>
    %19 = vector.multi_reduction <add>, %17, %cst_7 [1] : vector<8x256xf32> to vector<8xf32>
    %20 = vector.shape_cast %19 : vector<8xf32> to vector<8x1xf32>
    %cst_8 = arith.constant dense<0.000000e+00> : vector<8xf32>
    %21 = vector.multi_reduction <add>, %18, %cst_8 [1] : vector<8x256xf32> to vector<8xf32>
    %22 = vector.shape_cast %21 : vector<8xf32> to vector<8x1xf32>
    %23 = tpu.reciprocal %20 : vector<8x1xf32> -> vector<8x1xf32>
    %24 = vector.broadcast %23 : vector<8x1xf32> to vector<8x256xf32>
    %25 = arith.mulf %17, %24 : vector<8x256xf32>
    %26 = arith.subf %14, %16 : vector<8x256xf32>
    %27 = arith.mulf %25, %26 : vector<8x256xf32>
    %cst_9 = arith.constant dense<0.000000e+00> : vector<8xf32>
    %28 = vector.multi_reduction <add>, %27, %cst_9 [1] : vector<8x256xf32> to vector<8xf32>
    %29 = vector.shape_cast %28 : vector<8xf32> to vector<8x1xf32>
    %30 = math.log %20 : vector<8x1xf32>
    %31 = math.log %22 : vector<8x1xf32>
    %32 = arith.subf %30, %31 : vector<8x1xf32>
    %33 = arith.subf %29, %32 : vector<8x1xf32>
    %c0_10 = arith.constant 0 : index
    %34 = memref.load %arg3[%c0_10] : memref<1xf32, #tpu.memory_space<smem>>
    %35 = vector.shape_cast %33 : vector<8x1xf32> to vector<1x8x1xf32>
    %cst_11 = arith.constant dense<0.000000e+00> : vector<1xf32>
    %36 = vector.multi_reduction <add>, %35, %cst_11 [1, 2] : vector<1x8x1xf32> to vector<1xf32>
    %37 = vector.shape_cast %36 : vector<1xf32> to vector<1x1x1xf32>
    %38 = vector.extract %37[0, 0, 0] : f32 from vector<1x1x1xf32>
    %39 = arith.addf %34, %38 : f32
    %c0_12 = arith.constant 0 : index
    %40 = memref.load %arg3[%c0_12] : memref<1xf32, #tpu.memory_space<smem>>
    memref.store %39, %arg3[%c0_12] : memref<1xf32, #tpu.memory_space<smem>>
    %c0_i32_13 = arith.constant 0 : i32
    %41 = arith.cmpi eq, %arg0, %c0_i32_13 : i32
    %42 = arith.extui %41 : i1 to i32
    %c0_i32_14 = arith.constant 0 : i32
    %43 = arith.cmpi ne, %42, %c0_i32_14 : i32
    scf.if %43 {
      %c0_15 = arith.constant 0 : index
      %44 = memref.load %arg3[%c0_15] : memref<1xf32, #tpu.memory_space<smem>>
      %cst_16 = arith.constant 2.000000e+00 : f32
      %45 = arith.mulf %44, %cst_16 : f32
      %c0_17 = arith.constant 0 : index
      %46 = memref.load %arg3[%c0_17] : memref<1xf32, #tpu.memory_space<smem>>
      memref.store %45, %arg3[%c0_17] : memref<1xf32, #tpu.memory_space<smem>>
    } else {
    }
    return
  }
  func.func @transform_0(%arg0: i32) -> (i32, i32) {
    %c0_i32 = arith.constant 0 : i32
    %c0_i32_0 = arith.constant 0 : i32
    return %arg0, %c0_i32 : i32, i32
  }
  func.func @transform_1(%arg0: i32) -> (i32, i32) {
    %c0_i32 = arith.constant 0 : i32
    %c0_i32_0 = arith.constant 0 : i32
    return %arg0, %c0_i32 : i32, i32
  }
  func.func @transform_2(%arg0: i32) -> i32 {
    %c0_i32 = arith.constant 0 : i32
    %c0_i32_0 = arith.constant 0 : i32
    return %c0_i32 : i32
  }
}

</mosaic_0001>

<bundles_post_ra>
// kernel: tpu_custom_call.1
= control target key start
LH: loop header
LB: loop body
LE: loop exit
PB: predicated region body
PF: predicated region fallthrough
CT: control target
= control target key end

     0   :  { %7 = vsyncpa [#allocation3], 0  ;;  %s258_s0 = inlined_call_operand.hbm [shape: f32[8,256], index: 0, kind: input, shape index: {}]   ;;  %s259_s1 = inlined_call_operand.hbm [shape: f32[8,256], index: 1, kind: input, shape index: {}]   ;;  %s260_s2 = inlined_call_operand.hbm [shape: f32[1], index: 2, kind: output, shape index: {}]  }
   0x1   :  { %8 = vsyncpa [#allocation6], 0 }
   0x2   :  { %9 = vsyncpa [#allocation4], 0  ;;  %s15_s11 = sshll.u32 %s258_s0, 4  ;;  %s231_s12 = smov [#allocation2]   ;;  %s16_s11 = int_to_ptr.hbm [resolvable:$true] %s15_s11 }
   0x3   :  { %s17_s13 = sshll.u32 %s231_s12, 4  ;;  %s26_s16 = sshll.u32 %s259_s1, 4  ;;  %s18_s13 = int_to_ptr.vmem [resolvable:$true] %s17_s13  ;;  %s27_s16 = int_to_ptr.hbm [resolvable:$true] %s26_s16 }
   0x4   :  { %20 = dma.hbm_to_vmem [thread:$0]  %s16_s11, 256, %s18_s13, [#allocation3]  }
   0x5   :  { %s232_s17 = smov [#allocation5]  }
   0x6   :  { %s28_s18 = sshll.u32 %s232_s17, 4  ;;  %s29_s18 = int_to_ptr.vmem [resolvable:$true] %s28_s18 }
   0x7   :  { %31 = dma.hbm_to_vmem [thread:$0]  %s27_s16, 256, %s29_s18, [#allocation6]  }
   0x8   :  { %225 = dma.done.wait [#allocation3], 256  }
   0x9   :  { %226 = vsyncadd [#allocation3], 4294967040 }
   0xa   :  { %227 = dma.done.wait [#allocation6], 256  }
   0xb   :  { %228 = vsyncadd [#allocation6], 4294967040  ;;  %v50_v0 = vld [vmem:[#allocation5] sm:$0xff]  ;;  %v51_v1 = vld [vmem:[#allocation5 + $0x8] sm:$0xff]  ;;  %vm108_vm4 = vcmask 7168   ;;  %s133_s20 = sshll.u32 %s260_s2, 4  ;;  %s134_s20 = int_to_ptr.hbm [resolvable:$true] %s133_s20 }
   0xc   :  { %v52_v2 = vmul.f32 0.25, %v50_v0  ;;  %v53_v3 = vmul.f32 0.25, %v51_v1  ;;  %v46_v4 = vld [vmem:[#allocation2] sm:$0xff]  ;;  %v47_v5 = vld [vmem:[#allocation2 + $0x8] sm:$0xff]  ;;  %s233_s22 = smov [#allocation7]  }
   0xd   :  { %v48_v7 = vmul.f32 0.25, %v46_v4  ;;  %v49_v8 = vmul.f32 0.25, %v47_v5 }
   0xe   :  { %v54_v6 = vmax.f32 %v52_v2, %v53_v3 }
   0xf   :  { %v57_v9 = vmax.f32 %v48_v7, %v49_v8 }
  0x10   :  { %55 = vmax.xlane.f32.xlu0 %v54_v6 }
  0x18   :  { %58 = vmax.xlane.f32.xlu0 %v57_v9 }
  0x83   :  { %v56_v10 = vpop.xlane.xlu0 %55 }
  0x84   :  { %v60_v11 = vsub.f32 %v52_v2, %v56_v10  ;;  %v61_v12 = vsub.f32 %v53_v3, %v56_v10 }
  0x86   :  { %v64_v13 = vmul.f32 1.442695, %v60_v11  ;;  %v66_v14 = vmul.f32 1.442695, %v61_v12 }
  0x88   :  { %151 = vpow2.f32 %v64_v13 }
  0x89   :  { %153 = vpow2.f32 %v66_v14 }
  0x8b   :  { %v59_v15 = vpop.xlane.xlu0 %58 }
  0x8c   :  { %v62_v16 = vsub.f32 %v48_v7, %v59_v15  ;;  %v63_v17 = vsub.f32 %v49_v8, %v59_v15 }
  0x8e   :  { %v152_v18 = vpop.eup %151  ;;  %v68_v19 = vmul.f32 1.442695, %v62_v16  ;;  %v70_v20 = vmul.f32 1.442695, %v63_v17  ;;  %v94_v21 = vsub.f32 %v60_v11, %v62_v16  ;;  %v95_v22 = vsub.f32 %v61_v12, %v63_v17 }
  0x8f   :  { %v154_v23 = vpop.eup %153 }
  0x90   :  { %155 = vpow2.f32 %v68_v19  ;;  %v72_v24 = vadd.f32 %v154_v23, %v152_v18 }
  0x91   :  { %157 = vpow2.f32 %v70_v20 }
  0x92   :  { %73 = vadd.xlane.f32.xlu1 %v72_v24 }
  0x96   :  { %v156_v25 = vpop.eup %155 }
  0x97   :  { %v158_v26 = vpop.eup %157 }
  0x98   :  { %v75_v27 = vadd.f32 %v158_v26, %v156_v25 }
  0x9a   :  { %76 = vadd.xlane.f32.xlu1 %v75_v27 }
 0x105   :  { %v74_v28 = vpop.xlane.xlu1 %73 }
 0x106   :  { %159 = vrcp.f32 %v74_v28  ;;  %v89_v32 = vand.u32 2147483648, %v74_v28  ;;  %v87_v34 = vand.u32 2147483647, %v74_v28  ;;  %vm83_vm1 = vweird.f32 %v74_v28 }
 0x108   :  { %v90_v36 = vor.u32 1.1754944e-38, %v89_v32  ;;  %vm88_vm3 = vcmp.eq.f32.partialorder %v87_v34, 8.507059e+37 }
 0x10c   :  { %v160_v29 = vpop.eup %159 }
 0x10d   :  { %v79_v30 = vmul.f32 %v160_v29, %v74_v28  ;;  %vm84_vm0 = vweird.f32 %v160_v29  ;;  %v77_v44 = vpop.xlane.xlu1 %76 }
 0x10e   :  { %vm85_vm2 = vmor %vm83_vm1, %vm84_vm0  ;;  %161 = vlog2.f32 %v77_v44 }
 0x10f   :  { %v80_v31 = vsub.f32 1.0, %v79_v30  ;;  %163 = vlog2.f32 %v74_v28 }
 0x111   :  { %v81_v33 = vmul.f32 %v160_v29, %v80_v31 }
 0x113   :  { %v82_v35 = vadd.f32 %v160_v29, %v81_v33 }
 0x114   :  { %v162_v45 = vpop.eup %161 }
 0x115   :  { %v86_v37 = vsel %vm85_vm2, %v160_v29, %v82_v35  ;;  %v164_v46 = vpop.eup %163  ;;  %v104_v47 = vmul.f32 0.6931472, %v162_v45 }
 0x116   :  { %v91_v38 = vsel %vm88_vm3, %v90_v36, %v86_v37  ;;  %v102_v48 = vmul.f32 0.6931472, %v164_v46 }
 0x117   :  { %v92_v39 = vmul.f32 %v152_v18, %v91_v38  ;;  %v93_v40 = vmul.f32 %v154_v23, %v91_v38 }
 0x118   :  { %v105_v49 = vsub.f32 %v102_v48, %v104_v47 }
 0x119   :  { %v96_v41 = vmul.f32 %v94_v21, %v92_v39  ;;  %v97_v42 = vmul.f32 %v95_v22, %v93_v40 }
 0x11b   :  { %v98_v43 = vadd.f32 %v97_v42, %v96_v41 }
 0x11d   :  { %99 = vadd.xlane.f32.xlu2 %v98_v43 }
 0x190   :  { %v100_v50 = vpop.xlane.xlu2 %99 }
 0x191   :  { %v106_v51 = vsub.f32 %v100_v50, %v105_v49 }
 0x193   :  { %v109_v52 = vsel %vm108_vm4, %v106_v51, 0.0 }
 0x194   :  { %110 = vadd.xlane.f32.xlu2 %v109_v52 }
 0x207   :  { %v111_v53 = vpop.xlane.xlu2 %110 }
 0x208   :  { %v112_v54 = vrot.slane %v111_v53, 4 }
 0x20a   :  { %v113_v55 = vadd.f32 %v112_v54, %v111_v53 }
 0x20c   :  { %v114_v56 = vrot.slane %v113_v55, 2 }
 0x20e   :  { %v115_v57 = vadd.f32 %v114_v56, %v113_v55 }
 0x210   :  { %v116_v58 = vrot.slane %v115_v57, 1 }
 0x212   :  { %v117_v59 = vadd.f32 %v116_v58, %v115_v57 }
 0x214   :  { %145 = vpush %v117_v59 }
 0x245   :  { %s146_s0 = spop %145 }
 0x246   :  { %s126_s21 = smul.f32 2.0, %s146_s0 }
 0x248   :  { %127 = sst [smem:[#allocation7]] %s126_s21 }
 0x249   :  { %136 = dma.smem_to_hbm %s233_s22, 16, %s134_s20, [#allocation4]  }
 0x24a   :  { %229 = dma.done.wait [#allocation4], 16  }
 0x24b   :  { %230 = vsyncadd [#allocation4], 4294967280 }
 0x24c   :  { %141 = sfence }
 0x24d   :  { %142 = vsyncpa [#allocation3], 1 }
 0x24e   :  { %143 = vsyncpa [#allocation6], 1 }
 0x24f   :  { %144 = vsyncpa [#allocation4], 1 }

</bundles_post_ra>
